<compile_context>
chip_gen: v7x
topology: tpu7x:2x2x1
jax: 0.10.0
libtpu: 0.0.40
codegen_flags: <defaults>
</compile_context>

<pallas_src>
import functools

import jax
import jax.numpy as jnp
import numpy as np
from jax.experimental import pallas as pl
from jax.experimental.pallas import tpu as pltpu


def _matmul_kernel(x_ref, ht_ref, y_ref, acc_ref):
    """One (tb, tk) x (tk, tm) MXU step of y = x @ H^T with f32 accumulation."""
    k = pl.program_id(2)

    @pl.when(k == 0)
    def _():
        acc_ref[...] = jnp.zeros_like(acc_ref)

    acc_ref[...] += jnp.dot(
        x_ref[...], ht_ref[...], preferred_element_type=jnp.float32
    )

    @pl.when(k == pl.num_programs(2) - 1)
    def _():
        y_ref[...] = acc_ref[...].astype(y_ref.dtype)


def _round_up(a: int, b: int) -> int:
    return (a + b - 1) // b * b


def _choose_tile(size: int, max_tile: int, align: int):
    """Returns (tile, padded_size) with tile % align == 0 and padded_size % tile == 0."""
    padded = _round_up(size, align)
    if padded <= max_tile:
        return padded, padded
    return max_tile, _round_up(padded, max_tile)


@functools.partial(jax.jit, static_argnames=())
def linear_forward(H: jax.Array, x: jax.Array) -> jax.Array:
    """y = x @ H^T  (i.e. Linear.forward of spyrit.core.meas.Linear).

    H: (M, N) float32 measurement matrix
    x: (*, N) float32 batch of vectorized images
    returns y: (*, M) float32
    """
    M, N = H.shape
    *batch_dims, N_x = x.shape
    assert N_x == N, "last dim of x must equal number of pixels N"

    # Flatten all leading batch dims into one.
    B = int(np.prod(batch_dims)) if batch_dims else 1
    x2 = x.reshape(B, N)

    # Tile / pad sizes: B padded to sublane (8) multiples, M and N to lane (128) multiples.
    tb, Bp = _choose_tile(B, 256, 8)
    tm, Mp = _choose_tile(M, 512, 128)
    tk, Np = _choose_tile(N, 512, 128)

    # bf16 MXU operands, f32 accumulation.  H is transposed once so the kernel does a
    # canonical (tb, tk) @ (tk, tm) matmul with a lane-dense (tm) output.
    x_p = jnp.pad(x2, ((0, Bp - B), (0, Np - N))).astype(jnp.bfloat16)
    ht_p = jnp.pad(H.T, ((0, Np - N), (0, Mp - M))).astype(jnp.bfloat16)

    grid = (Bp // tb, Mp // tm, Np // tk)

    cost = pl.CostEstimate(
        flops=2 * Bp * Mp * Np,
        transcendentals=0,
        bytes_accessed=x_p.size * 2 + ht_p.size * 2 + Bp * Mp * 4,
    )

    y_p = pl.pallas_call(
        _matmul_kernel,
        out_shape=jax.ShapeDtypeStruct((Bp, Mp), jnp.float32),
        grid_spec=pltpu.PrefetchScalarGridSpec(
            num_scalar_prefetch=0,
            grid=grid,
            in_specs=[
                pl.BlockSpec((tb, tk), lambda i, j, k: (i, k)),  # x tile
                pl.BlockSpec((tk, tm), lambda i, j, k: (k, j)),  # H^T tile
            ],
            out_specs=pl.BlockSpec((tb, tm), lambda i, j, k: (i, j)),
            scratch_shapes=[pltpu.VMEM((tb, tm), jnp.float32)],
        ),
        compiler_params=pltpu.CompilerParams(
            dimension_semantics=("parallel", "parallel", "arbitrary"),
        ),
        cost_estimate=cost,
    )(x_p, ht_p)

    y = y_p[:B, :M]
    return y.reshape(*batch_dims, M) if batch_dims else y.reshape(M)


if __name__ == "__main__":
    # Small deterministic problem consistent with the module: 16x16 images (N = 256),
    # M = 128 measurements, batch of shape (2, 5) -> flattened B = 10.
    h = w = 16
    N = h * w          # 256
    M = 128
    batch_shape = (2, 5)

    key = jax.random.PRNGKey(0)
    k_h, k_x = jax.random.split(key)

    H = jax.random.uniform(k_h, (M, N), dtype=jnp.float32)
    x = jax.random.uniform(k_x, (*batch_shape, N), dtype=jnp.float32)

    y = linear_forward(H, x)
    y = jax.block_until_ready(y)

    assert y.shape == (*batch_shape, M), y.shape

    # Reference: same bf16 quantization of the operands, f32 accumulation (pure JAX).
    x_q = x.astype(jnp.bfloat16).astype(jnp.float32)
    H_q = H.astype(jnp.bfloat16).astype(jnp.float32)
    y_ref = jnp.einsum("...n,mn->...m", x_q, H_q)

    np.testing.assert_allclose(np.asarray(y), np.asarray(y_ref), rtol=1e-4, atol=1e-3)

    # Also sanity-check against the full-precision reference (bf16 input quantization only).
    y_ref_f32 = jnp.einsum("...n,mn->...m", x, H)
    np.testing.assert_allclose(np.asarray(y), np.asarray(y_ref_f32), rtol=3e-2, atol=3e-1)

    print("KERNEL_OK")
</pallas_src>

<mosaic_0001>
module attributes {stable_mosaic.version = 11 : i64} {
  func.func @_matmul_kernel(%arg0: i32, %arg1: i32, %arg2: i32, %arg3: memref<16x256xbf16, #tpu.memory_space<vmem>>, %arg4: memref<256x128xbf16, #tpu.memory_space<vmem>>, %arg5: memref<16x128xf32, #tpu.memory_space<vmem>>, %arg6: memref<16x128xf32, #tpu.memory_space<vmem>>) attributes {dimension_semantics = [#tpu.dimension_semantics<parallel>, #tpu.dimension_semantics<parallel>, #tpu.dimension_semantics<arbitrary>], iteration_bounds = array<i64: 1, 1, 1>, scalar_prefetch = 0 : i64, scratch_operands = 1 : i64, tpu.core_type = #tpu.core_type<tc>, window_params = [{transform_indices = @transform_0, window_bounds = array<i64: 16, 256>}, {transform_indices = @transform_1, window_bounds = array<i64: 256, 128>}, {transform_indices = @transform_2, window_bounds = array<i64: 16, 128>}]} {
    %c0_i32 = arith.constant 0 : i32
    %0 = arith.cmpi eq, %arg2, %c0_i32 : i32
    %1 = arith.extui %0 : i1 to i32
    %c0_i32_0 = arith.constant 0 : i32
    %2 = arith.cmpi ne, %1, %c0_i32_0 : i32
    scf.if %2 {
      %cst_10 = arith.constant 0.000000e+00 : f32
      %12 = vector.broadcast %cst_10 : f32 to vector<16x128xf32>
      %c0_11 = arith.constant 0 : index
      %c0_12 = arith.constant 0 : index
      %13 = vector.load %arg6[%c0_11, %c0_12] : memref<16x128xf32, #tpu.memory_space<vmem>>, vector<16x128xf32>
      tpu.vector_store %arg6[%c0_11, %c0_12], %12 {strides = array<i32>} : memref<16x128xf32, #tpu.memory_space<vmem>>, vector<16x128xf32>,
    } else {
    }
    %c0 = arith.constant 0 : index
    %c0_1 = arith.constant 0 : index
    %3 = vector.load %arg6[%c0, %c0_1] : memref<16x128xf32, #tpu.memory_space<vmem>>, vector<16x128xf32>
    %c0_2 = arith.constant 0 : index
    %c0_3 = arith.constant 0 : index
    %4 = vector.load %arg3[%c0_2, %c0_3] : memref<16x256xbf16, #tpu.memory_space<vmem>>, vector<16x256xbf16>
    %c0_4 = arith.constant 0 : index
    %c0_5 = arith.constant 0 : index
    %5 = vector.load %arg4[%c0_4, %c0_5] : memref<256x128xbf16, #tpu.memory_space<vmem>>, vector<256x128xbf16>
    %cst = arith.constant dense<0.000000e+00> : vector<16x128xf32>
    %6 = tpu.matmul %4, %5, %cst {dimension_numbers = #tpu.dot_dimension_numbers<[1], [0], [0], [1], [0, 0, 1, 1], [], []>} : vector<16x256xbf16>, vector<256x128xbf16>, vector<16x128xf32> -> vector<16x128xf32>
    %7 = arith.addf %3, %6 : vector<16x128xf32>
    %c0_6 = arith.constant 0 : index
    %c0_7 = arith.constant 0 : index
    %8 = vector.load %arg6[%c0_6, %c0_7] : memref<16x128xf32, #tpu.memory_space<vmem>>, vector<16x128xf32>
    tpu.vector_store %arg6[%c0_6, %c0_7], %7 {strides = array<i32>} : memref<16x128xf32, #tpu.memory_space<vmem>>, vector<16x128xf32>,
    %c0_i32_8 = arith.constant 0 : i32
    %9 = arith.cmpi eq, %arg2, %c0_i32_8 : i32
    %10 = arith.extui %9 : i1 to i32
    %c0_i32_9 = arith.constant 0 : i32
    %11 = arith.cmpi ne, %10, %c0_i32_9 : i32
    scf.if %11 {
      %c0_10 = arith.constant 0 : index
      %c0_11 = arith.constant 0 : index
      %12 = vector.load %arg6[%c0_10, %c0_11] : memref<16x128xf32, #tpu.memory_space<vmem>>, vector<16x128xf32>
      %c0_12 = arith.constant 0 : index
      %c0_13 = arith.constant 0 : index
      %13 = vector.load %arg5[%c0_12, %c0_13] : memref<16x128xf32, #tpu.memory_space<vmem>>, vector<16x128xf32>
      tpu.vector_store %arg5[%c0_12, %c0_13], %12 {strides = array<i32>} : memref<16x128xf32, #tpu.memory_space<vmem>>, vector<16x128xf32>,
    } else {
    }
    return
  }
  func.func @transform_0(%arg0: i32, %arg1: i32, %arg2: i32) -> (i32, i32) {
    %c0_i32 = arith.constant 0 : i32
    return %arg0, %arg2 : i32, i32
  }
  func.func @transform_1(%arg0: i32, %arg1: i32, %arg2: i32) -> (i32, i32) {
    %c0_i32 = arith.constant 0 : i32
    return %arg2, %arg1 : i32, i32
  }
  func.func @transform_2(%arg0: i32, %arg1: i32, %arg2: i32) -> (i32, i32) {
    %c0_i32 = arith.constant 0 : i32
    return %arg0, %arg1 : i32, i32
  }
}

</mosaic_0001>

<bundles_post_ra>
// kernel: linear_forward.1
= control target key start
LH: loop header
LB: loop body
LE: loop exit
PB: predicated region body
PF: predicated region fallthrough
CT: control target
= control target key end

     0   :  { %s350_s1 = inlined_call_operand.vmem [shape: bf16[256,128], index: 1, kind: input, shape index: {}]   ;;  %s351_s0 = inlined_call_operand.vmem [shape: bf16[16,256], index: 0, kind: input, shape index: {}]   ;;  %s352_s2 = inlined_call_operand.vmem [shape: f32[16,128], index: 2, kind: output, shape index: {}]  }
   0x1   :  { %v256_v0 = vld [vmem:[%s350_s1 + $0x40] sm:$0xff]   ;;  %v258_v2 = vld [vmem:[%s350_s1 + $0x48] sm:$0xff]   ;;  %v260_v4 = vld [vmem:[%s350_s1 + $0x50] sm:$0xff]  }
   0x2   :  { %v257_v1 = vld [vmem:[%s350_s1] sm:$0xff]   ;;  %234 = vmatprep.subr.bf16.mxu0 %v256_v0  ;;  %v259_v3 = vld [vmem:[%s350_s1 + $0x8] sm:$0xff]   ;;  %v261_v5 = vld [vmem:[%s350_s1 + $0x10] sm:$0xff]  }
   0x3   :  { %235 = vmatpush3.bf16.msra.mxu0 %v257_v1  ;;  %v262_v6 = vld [vmem:[%s350_s1 + $0x58] sm:$0xff]   ;;  %v264_v8 = vld [vmem:[%s350_s1 + $0x60] sm:$0xff]   ;;  %v266_v10 = vld [vmem:[%s350_s1 + $0x68] sm:$0xff]  }
   0x4   :  { %236 = vmatprep.subr.bf16.mxu0 %v258_v2  ;;  %v263_v7 = vld [vmem:[%s350_s1 + $0x18] sm:$0xff]   ;;  %v265_v9 = vld [vmem:[%s350_s1 + $0x20] sm:$0xff]   ;;  %v267_v12 = vld [vmem:[%s350_s1 + $0x28] sm:$0xff]  }
   0x5   :  { %v274_v11 = vld [vmem:[%s351_s0 + $0x4] ss:$8 sps:$4 sm:$0xff]   ;;  %v268_v13 = vld [vmem:[%s350_s1 + $0x70] sm:$0xff]   ;;  %v270_v15 = vld [vmem:[%s350_s1 + $0x78] sm:$0xff]  }
   0x6   :  { %192 = vmatprep.mubr.bf16.mxu0 %v274_v11  ;;  %v269_v14 = vld [vmem:[%s350_s1 + $0x30] sm:$0xff]   ;;  %v271_v16 = vld [vmem:[%s350_s1 + $0x38] sm:$0xff]   ;;  %v272_v17 = vld [vmem:[%s351_s0] ss:$8 sps:$4 sm:$0xff]  }
   0x7   :  { %237 = vmatpush3.bf16.msra.mxu0 %v259_v3 }
   0x8   :  { %238 = vmatprep.subr.bf16.mxu0 %v260_v4 }
   0xb   :  { %239 = vmatpush3.bf16.msra.mxu0 %v261_v5 }
   0xc   :  { %240 = vmatprep.subr.bf16.mxu0 %v262_v6 }
   0xf   :  { %241 = vmatpush3.bf16.msra.mxu0 %v263_v7 }
  0x10   :  { %242 = vmatprep.subr.bf16.mxu0 %v264_v8 }
  0x13   :  { %243 = vmatpush3.bf16.msra.mxu0 %v265_v9 }
  0x14   :  { %244 = vmatprep.subr.bf16.mxu0 %v266_v10 }
  0x17   :  { %245 = vmatpush3.bf16.msra.mxu0 %v267_v12 }
  0x18   :  { %246 = vmatprep.subr.bf16.mxu0 %v268_v13 }
  0x1b   :  { %247 = vmatpush3.bf16.msra.mxu0 %v269_v14 }
  0x1c   :  { %248 = vmatprep.subr.bf16.mxu0 %v270_v15 }
  0x1f   :  { %249 = vmatpush3.bf16.msra.mxu0 %v271_v16 }
  0x22   :  { %193 = vmatmul.mubr.bf16.vlgmr.msra.gmra.mrb[0].mxu0 %v272_v17 }
  0xf5   :  { %v250_v18 = vpop.f32.mrb[0].mxu0 }
  0xf6   :  { %v251_v19 = vpop.f32.mrb[1].mxu0 }
  0xf7   :  { %v252_v20 = vadd.f32 %v251_v19, %v250_v18  ;;  %v253_v21 = vpop.f32.mrb[2].mxu0 }
  0xf8   :  { %v254_v22 = vpop.f32.mrb[3].mxu0 }
  0xf9   :  { %210 = vst [vmem:[%s352_s2] sm:$0xff] %v252_v20  ;;  %v255_v23 = vadd.f32 %v254_v22, %v253_v21 }
  0xfb   :  { %211 = vst [vmem:[%s352_s2 + $0x8] sm:$0xff] %v255_v23 }

</bundles_post_ra>
